<compile_context>
chip_gen: v6e
topology: v6e:2x2x1
jax: 0.10.0
libtpu: 0.0.40
codegen_flags: <defaults>
</compile_context>

<pallas_src>
import functools
import math

import jax
import jax.numpy as jnp
from jax.experimental import pallas as pl
from jax.experimental.pallas import tpu as pltpu


def _moving_avg_kernel(x_ref, out_ref, xpad_ref, *, kernel_size, stride,
                       front, end, l_in, l_out):
    """One (batch-tile, channel-tile) block.

    x_ref:    (b_blk, L,     c_blk)  input tile (auto-pipelined VMEM)
    out_ref:  (b_blk, L_out, c_blk)  output tile
    xpad_ref: (b_blk, L_pad, c_blk)  f32 scratch holding the replication-padded
                                     time axis (padding fused here, not in HBM)
    """
    b_blk, _, c_blk = x_ref.shape
    x = x_ref[...].astype(jnp.float32)

    # Build the replication-padded sequence in VMEM (fused padding).
    xpad_ref[:, front:front + l_in, :] = x
    if front > 0:
        xpad_ref[:, 0:front, :] = jnp.broadcast_to(
            x[:, 0:1, :], (b_blk, front, c_blk))
    if end > 0:
        xpad_ref[:, front + l_in:front + l_in + end, :] = jnp.broadcast_to(
            x[:, l_in - 1:l_in, :], (b_blk, end, c_blk))

    # Accumulate the kernel_size taps; initialize from tap 0 (saves a zeros
    # init + one add).  kernel_size is small & static -> unrolled.
    if stride == 1:
        acc = xpad_ref[:, 0:l_out, :]
        for k in range(1, kernel_size):
            acc = acc + xpad_ref[:, k:k + l_out, :]
    else:
        # Strided sublane reads (ref[pl.ds(..., stride=k)]).  For large strides
        # a contiguous-reshape formulation could shave a little XLU/vld work,
        # but this op is HBM-bound so it is not the bottleneck.
        acc = xpad_ref[:, pl.ds(0, l_out, stride=stride), :]
        for k in range(1, kernel_size):
            acc = acc + xpad_ref[:, pl.ds(k, l_out, stride=stride), :]

    out_ref[...] = (acc * (1.0 / kernel_size)).astype(out_ref.dtype)


def _choose_tiles(B, C, L, L_pad, L_out, itemsize, budget_bytes):
    """Pick (b_blk, c_blk) so the per-step VMEM footprint fits `budget_bytes`."""

    def footprint(b_blk, c_blk):
        in_b = 2 * b_blk * L * c_blk * itemsize        # double-buffered input
        out_b = 2 * b_blk * L_out * c_blk * itemsize   # double-buffered output
        pad_b = b_blk * L_pad * c_blk * 4              # f32 padded scratch
        return in_b + out_b + pad_b

    # Channel tiling is halo-free (pooling is along time only).  Prefer
    # lane-dense multiples of 128; otherwise take the full channel dim
    # (satisfies the "block dim == full array dim" rule, and avoids paying an
    # extra HBM transpose pass just for lane density on a mem-bound op).
    if C % 128 == 0:
        cands = [c for c in range(128, C + 1, 128) if C % c == 0]
        fit = [c for c in cands if footprint(1, c) <= budget_bytes]
        c_blk = max(fit) if fit else 128
    else:
        c_blk = C

    # Batch tiling: largest divisor of B that still fits the budget.
    b_cands = [b for b in range(1, B + 1) if B % b == 0]
    fit = [b for b in b_cands if footprint(b, c_blk) <= budget_bytes]
    b_blk = max(fit) if fit else 1

    # v7x has 2 TensorCores: keep >= 2 parallel grid blocks when splitting
    # still leaves >= 1 MiB of work per block (no-op for tiny problems and
    # for single-TC v5e/v6e).
    if (B // b_blk) * (C // c_blk) == 1 and b_blk % 2 == 0 \
            and footprint(b_blk // 2, c_blk) >= (1 << 20):
        b_blk //= 2

    return b_blk, c_blk


def moving_avg(x, kernel_size, stride=1, *, vmem_budget_bytes=10 * 1024 * 1024):
    """Replicates moving_avg(kernel_size, stride).forward(x) for x of shape (B, L, C)."""
    B, L, C = x.shape

    # Same asymmetric replication-pad counts as the PyTorch module.
    front = kernel_size - 1 - (kernel_size - 1) // 2
    end = (kernel_size - 1) // 2
    L_pad = L + front + end
    # AvgPool1d(kernel_size, stride, padding=0) output length.
    L_out = (L_pad - kernel_size) // stride + 1

    b_blk, c_blk = _choose_tiles(B, C, L, L_pad, L_out, x.dtype.itemsize,
                                 vmem_budget_bytes)
    grid = (B // b_blk, C // c_blk)

    kernel = functools.partial(
        _moving_avg_kernel, kernel_size=kernel_size, stride=stride,
        front=front, end=end, l_in=L, l_out=L_out)

    return pl.pallas_call(
        kernel,
        out_shape=jax.ShapeDtypeStruct((B, L_out, C), x.dtype),
        grid_spec=pltpu.PrefetchScalarGridSpec(
            num_scalar_prefetch=0,
            grid=grid,
            in_specs=[
                pl.BlockSpec((b_blk, L, c_blk), lambda bi, ci: (bi, 0, ci)),
            ],
            out_specs=pl.BlockSpec((b_blk, L_out, c_blk),
                                   lambda bi, ci: (bi, 0, ci)),
            scratch_shapes=[pltpu.VMEM((b_blk, L_pad, c_blk), jnp.float32)],
        ),
        compiler_params=pltpu.CompilerParams(
            dimension_semantics=("parallel", "parallel"),
            vmem_limit_bytes=32 * 1024 * 1024,
        ),
    )(x)


def _moving_avg_ref(x, kernel_size, stride):
    """Pure-JAX reference mirroring the PyTorch forward exactly."""
    front = kernel_size - 1 - math.floor((kernel_size - 1) // 2)
    end = math.floor((kernel_size - 1) // 2)
    pieces = []
    if front > 0:
        pieces.append(jnp.repeat(x[:, 0:1, :], front, axis=1))
    pieces.append(x)
    if end > 0:
        pieces.append(jnp.repeat(x[:, -1:, :], end, axis=1))
    xp = jnp.concatenate(pieces, axis=1)
    L_pad = xp.shape[1]
    L_out = (L_pad - kernel_size) // stride + 1
    outs = [jnp.mean(xp[:, t * stride:t * stride + kernel_size, :], axis=1)
            for t in range(L_out)]
    return jnp.stack(outs, axis=1)


if __name__ == "__main__":
    # Small deterministic input: (batch=2, seq=16, channels=32)
    key = jax.random.PRNGKey(0)
    x = jax.random.normal(key, (2, 16, 32), dtype=jnp.float32)

    # Primary config: odd kernel, stride 1 (typical trend extraction).
    out = jax.block_until_ready(moving_avg(x, kernel_size=5, stride=1))
    ref = _moving_avg_ref(x, 5, 1)
    assert out.shape == ref.shape, (out.shape, ref.shape)
    assert jnp.allclose(out, ref, atol=1e-5, rtol=1e-5), "mismatch (k=5, s=1)"

    # Even kernel_size exercises the asymmetric front/end replication padding
    # exactly as written in the PyTorch module.
    out2 = jax.block_until_ready(moving_avg(x, kernel_size=4, stride=1))
    ref2 = _moving_avg_ref(x, 4, 1)
    assert out2.shape == ref2.shape, (out2.shape, ref2.shape)
    assert jnp.allclose(out2, ref2, atol=1e-5, rtol=1e-5), "mismatch (k=4, s=1)"

    print("KERNEL_OK")
</pallas_src>

<mosaic_0001>
module attributes {stable_mosaic.version = 11 : i64} {
  func.func @_moving_avg_kernel(%arg0: i32, %arg1: i32, %arg2: memref<2x16x32xf32, #tpu.memory_space<vmem>>, %arg3: memref<2x16x32xf32, #tpu.memory_space<vmem>>, %arg4: memref<2x20x32xf32, #tpu.memory_space<vmem>>) attributes {dimension_semantics = [#tpu.dimension_semantics<parallel>, #tpu.dimension_semantics<parallel>], iteration_bounds = array<i64: 1, 1>, scalar_prefetch = 0 : i64, scratch_operands = 1 : i64, tpu.core_type = #tpu.core_type<tc>, window_params = [{transform_indices = @transform_0, window_bounds = array<i64: 2, 16, 32>}, {transform_indices = @transform_1, window_bounds = array<i64: 2, 16, 32>}]} {
    %c0 = arith.constant 0 : index
    %c0_0 = arith.constant 0 : index
    %c0_1 = arith.constant 0 : index
    %0 = vector.load %arg2[%c0, %c0_0, %c0_1] : memref<2x16x32xf32, #tpu.memory_space<vmem>>, vector<2x16x32xf32>
    %c0_2 = arith.constant 0 : index
    %c2 = arith.constant 2 : index
    %c0_3 = arith.constant 0 : index
    %1 = vector.load %arg4[%c0_2, %c2, %c0_3] : memref<2x20x32xf32, #tpu.memory_space<vmem>>, vector<2x16x32xf32>
    tpu.vector_store %arg4[%c0_2, %c2, %c0_3], %0 {strides = array<i32>} : memref<2x20x32xf32, #tpu.memory_space<vmem>>, vector<2x16x32xf32>,
    %2 = vector.extract_strided_slice %0 {offsets = [0, 0, 0], sizes = [2, 1, 32], strides = [1, 1, 1]} : vector<2x16x32xf32> to vector<2x1x32xf32>
    %3 = vector.shape_cast %2 : vector<2x1x32xf32> to vector<2x1x32xf32>
    %4 = vector.broadcast %3 : vector<2x1x32xf32> to vector<2x2x32xf32>
    %c0_4 = arith.constant 0 : index
    %c0_5 = arith.constant 0 : index
    %c0_6 = arith.constant 0 : index
    %5 = vector.load %arg4[%c0_4, %c0_5, %c0_6] : memref<2x20x32xf32, #tpu.memory_space<vmem>>, vector<2x2x32xf32>
    tpu.vector_store %arg4[%c0_4, %c0_5, %c0_6], %4 {strides = array<i32>} : memref<2x20x32xf32, #tpu.memory_space<vmem>>, vector<2x2x32xf32>,
    %6 = vector.extract_strided_slice %0 {offsets = [0, 15, 0], sizes = [2, 1, 32], strides = [1, 1, 1]} : vector<2x16x32xf32> to vector<2x1x32xf32>
    %7 = vector.shape_cast %6 : vector<2x1x32xf32> to vector<2x1x32xf32>
    %8 = vector.broadcast %7 : vector<2x1x32xf32> to vector<2x2x32xf32>
    %c0_7 = arith.constant 0 : index
    %c18 = arith.constant 18 : index
    %c0_8 = arith.constant 0 : index
    %9 = vector.load %arg4[%c0_7, %c18, %c0_8] : memref<2x20x32xf32, #tpu.memory_space<vmem>>, vector<2x2x32xf32>
    tpu.vector_store %arg4[%c0_7, %c18, %c0_8], %8 {strides = array<i32>} : memref<2x20x32xf32, #tpu.memory_space<vmem>>, vector<2x2x32xf32>,
    %c0_9 = arith.constant 0 : index
    %c0_10 = arith.constant 0 : index
    %c0_11 = arith.constant 0 : index
    %10 = vector.load %arg4[%c0_9, %c0_10, %c0_11] : memref<2x20x32xf32, #tpu.memory_space<vmem>>, vector<2x16x32xf32>
    %c0_12 = arith.constant 0 : index
    %c1 = arith.constant 1 : index
    %c0_13 = arith.constant 0 : index
    %11 = vector.load %arg4[%c0_12, %c1, %c0_13] : memref<2x20x32xf32, #tpu.memory_space<vmem>>, vector<2x16x32xf32>
    %12 = arith.addf %10, %11 : vector<2x16x32xf32>
    %c0_14 = arith.constant 0 : index
    %c2_15 = arith.constant 2 : index
    %c0_16 = arith.constant 0 : index
    %13 = vector.load %arg4[%c0_14, %c2_15, %c0_16] : memref<2x20x32xf32, #tpu.memory_space<vmem>>, vector<2x16x32xf32>
    %14 = arith.addf %12, %13 : vector<2x16x32xf32>
    %c0_17 = arith.constant 0 : index
    %c3 = arith.constant 3 : index
    %c0_18 = arith.constant 0 : index
    %15 = vector.load %arg4[%c0_17, %c3, %c0_18] : memref<2x20x32xf32, #tpu.memory_space<vmem>>, vector<2x16x32xf32>
    %16 = arith.addf %14, %15 : vector<2x16x32xf32>
    %c0_19 = arith.constant 0 : index
    %c4 = arith.constant 4 : index
    %c0_20 = arith.constant 0 : index
    %17 = vector.load %arg4[%c0_19, %c4, %c0_20] : memref<2x20x32xf32, #tpu.memory_space<vmem>>, vector<2x16x32xf32>
    %18 = arith.addf %16, %17 : vector<2x16x32xf32>
    %cst = arith.constant 2.000000e-01 : f32
    %19 = vector.broadcast %cst : f32 to vector<2x16x32xf32>
    %20 = arith.mulf %18, %19 : vector<2x16x32xf32>
    %c0_21 = arith.constant 0 : index
    %c0_22 = arith.constant 0 : index
    %c0_23 = arith.constant 0 : index
    %21 = vector.load %arg3[%c0_21, %c0_22, %c0_23] : memref<2x16x32xf32, #tpu.memory_space<vmem>>, vector<2x16x32xf32>
    tpu.vector_store %arg3[%c0_21, %c0_22, %c0_23], %20 {strides = array<i32>} : memref<2x16x32xf32, #tpu.memory_space<vmem>>, vector<2x16x32xf32>,
    return
  }
  func.func @transform_0(%arg0: i32, %arg1: i32) -> (i32, i32, i32) {
    %c0_i32 = arith.constant 0 : i32
    %c0_i32_0 = arith.constant 0 : i32
    return %arg0, %c0_i32, %arg1 : i32, i32, i32
  }
  func.func @transform_1(%arg0: i32, %arg1: i32) -> (i32, i32, i32) {
    %c0_i32 = arith.constant 0 : i32
    %c0_i32_0 = arith.constant 0 : i32
    return %arg0, %c0_i32, %arg1 : i32, i32, i32
  }
}

</mosaic_0001>

<bundles_post_ra>
// kernel: tpu_custom_call.1
= control target key start
LH: loop header
LB: loop body
LE: loop exit
PB: predicated region body
PF: predicated region fallthrough
CT: control target
= control target key end

     0   :  { %6 = vsyncpa [#allocation4], 0  ;;  %s196_s0 = inlined_call_operand.hbm [shape: f32[2,16,32], index: 0, kind: input, shape index: {}]   ;;  %s197_s1 = inlined_call_operand.hbm [shape: f32[2,16,32], index: 1, kind: output, shape index: {}]  }
   0x1   :  { %7 = vsyncpa [#allocation5], 0  ;;  %s162_s6 = smov [#allocation3]  }
   0x2   :  { %s13_s7 = sshll.u32 %s162_s6, 4  ;;  %s14_s7 = int_to_ptr.vmem [resolvable:$true] %s13_s7 }
   0x3   :  { %s126_s8 = scalar_lea.vmem %s14_s7, 512  ;;  %p131_p1 = scmp.lt.s32.totalorder %s14_s7, %s14_s7 }
   0x4   :  { %p127_p0 = scmp.ne.s32.totalorder %s14_s7, %s126_s8  ;;  %p132_p2 = scmp.lt.s32.totalorder %s126_s8, %s126_s8 }
   0x6   :  { %p133_p3 = por %p132_p2, %p131_p1 }
   0x8   :  { %p134_p4 = pnand %p133_p3, %p127_p0 }
   0xa   :  { %137 = shalt.err (!%p134_p4)
}
   0xb   :  { %s163_s9 = smov 128   ;;  %s164_s10 = smov 8  }
   0xc   :  { %19 = dma.hbm_to_vmem [thread:$0]  %s196_s0, 512, %s14_s7, [#allocation4], %s163_s9, %s163_s9, %s164_s10  }
   0xd   :  { %158 = dma.done.wait [#allocation4], 512  }
   0xe   :  { %159 = vsyncadd [#allocation4], 4294966784  ;;  %v32_v0 = vlaneseq  ;;  %vm27_vm0 = vcmask 261120   ;;  %v23_v4 = vld [vmem:[#allocation3] sm:$0xff]  ;;  %v24_v5 = vld [vmem:[#allocation3 + $0x8] sm:$0xff]  ;;  %vm40_vm1 = vcmask 254976  }
   0xf   :  { %v25_v6 = vld [vmem:[#allocation3 + $0x10] sm:$0xff]  ;;  %28 = vst.msk [vmem:[#allocation2 + $0x2] sm:$0xff] %vm27_vm0, %v23_v4  ;;  %29 = vst.msk [vmem:[#allocation2 + $0xa] sm:$0xff] %vm27_vm0, %v24_v5  ;;  %v26_v10 = vld [vmem:[#allocation3 + $0x18] sm:$0xff]  ;;  %s165_s0 = smov [#allocation6]  }
  0x10   :  { %v33_v1 = vshrl.u32 %v32_v0, 7  ;;  %30 = vst.msk [vmem:[#allocation2 + $0x1a] sm:$0xff] %vm27_vm0, %v25_v6  ;;  %31 = vst.msk [vmem:[#allocation2 + $0x22] sm:$0xff] %vm27_vm0, %v26_v10  ;;  %s102_s13 = sshll.u32 %s165_s0, 4  ;;  %s103_s13 = int_to_ptr.vmem [resolvable:$true] %s102_s13 }
  0x11   :  { %s138_s14 = scalar_lea.vmem %s103_s13, 512  ;;  %p143_p6 = scmp.lt.s32.totalorder %s103_s13, %s103_s13 }
  0x12   :  { %v34_v2 = vsub.s32 0, %v33_v1  ;;  %v45_v3 = vsub.s32 7, %v33_v1  ;;  %p139_p5 = scmp.ne.s32.totalorder %s103_s13, %s138_s14  ;;  %p144_p7 = scmp.lt.s32.totalorder %s138_s14, %s138_s14 }
  0x14   :  { %v35_v7 = vrot.slane %v23_v4, %v34_v2  ;;  %v46_v8 = vrot.slane %v24_v5, %v45_v3  ;;  %v39_v9 = vrot.slane %v25_v6, %v34_v2  ;;  %v50_v11 = vrot.slane %v26_v10, %v45_v3  ;;  %p145_p8 = por %p144_p7, %p143_p6 }
  0x16   :  { %41 = vst.msk [vmem:[#allocation2] sm:$0x3] %vm40_vm1, %v35_v7  ;;  %42 = vst.msk [vmem:[#allocation2 + $0x18] sm:$0x3] %vm40_vm1, %v39_v9  ;;  %v54_v12 = vld [vmem:[#allocation2 + $0x8] sm:$0xff]  ;;  %p146_p9 = pnand %p145_p8, %p139_p5 }
  0x17   :  { %51 = vst.msk [vmem:[#allocation2 + $0x12] sm:$0x3] %vm40_vm1, %v46_v8  ;;  %52 = vst.msk [vmem:[#allocation2 + $0x2a] sm:$0x3] %vm40_vm1, %v50_v11  ;;  %v58_v13 = vld [vmem:[#allocation2 + $0x9] sm:$0xff]  ;;  %v56_v16 = vld [vmem:[#allocation2 + $0x20] sm:$0xff] }
  0x18   :  { %v66_v14 = vld [vmem:[#allocation2 + $0xa] sm:$0xff]  ;;  %v62_v15 = vadd.f32 %v58_v13, %v54_v12  ;;  %v60_v17 = vld [vmem:[#allocation2 + $0x21] sm:$0xff] }
  0x19   :  { %v68_v18 = vld [vmem:[#allocation2 + $0x22] sm:$0xff]  ;;  %v64_v19 = vadd.f32 %v60_v17, %v56_v16  ;;  %v67_v38 = vld [vmem:[#allocation2 + $0x1a] sm:$0xff] }
  0x1a   :  { %v70_v21 = vadd.f32 %v66_v14, %v62_v15  ;;  %v65_v28 = vld [vmem:[#allocation2 + $0x2] sm:$0xff] }
  0x1b   :  { %v72_v24 = vadd.f32 %v68_v18, %v64_v19  ;;  %v73_v37 = vld [vmem:[#allocation2 + $0x3] sm:$0xff]  ;;  %v75_v44 = vld [vmem:[#allocation2 + $0x1b] sm:$0xff] }
  0x1c   :  { %v81_v43 = vld [vmem:[#allocation2 + $0x4] sm:$0xff]  ;;  %v83_v48 = vld [vmem:[#allocation2 + $0x1c] sm:$0xff] }
  0x1d   :  { %v53_v20 = vld [vmem:[#allocation2] sm:$0xff]  ;;  %v55_v29 = vld [vmem:[#allocation2 + $0x18] sm:$0xff] }
  0x1e   :  { %v57_v22 = vld [vmem:[#allocation2 + $0x1] sm:$0xff]  ;;  %v74_v23 = vld [vmem:[#allocation2 + $0xb] sm:$0xff]  ;;  %v59_v30 = vld [vmem:[#allocation2 + $0x19] sm:$0xff] }
  0x1f   :  { %v76_v25 = vld [vmem:[#allocation2 + $0x23] sm:$0xff]  ;;  %v61_v26 = vadd.f32 %v57_v22, %v53_v20  ;;  %v78_v27 = vadd.f32 %v74_v23, %v70_v21  ;;  %v82_v31 = vld [vmem:[#allocation2 + $0xc] sm:$0xff]  ;;  %v63_v34 = vadd.f32 %v59_v30, %v55_v29 }
  0x20   :  { %v80_v32 = vadd.f32 %v76_v25, %v72_v24  ;;  %v84_v36 = vld [vmem:[#allocation2 + $0x24] sm:$0xff] }
  0x21   :  { %v69_v33 = vadd.f32 %v65_v28, %v61_v26  ;;  %v86_v35 = vadd.f32 %v82_v31, %v78_v27  ;;  %v71_v41 = vadd.f32 %v67_v38, %v63_v34 }
  0x22   :  { %v88_v39 = vadd.f32 %v84_v36, %v80_v32 }
  0x23   :  { %v77_v40 = vadd.f32 %v73_v37, %v69_v33  ;;  %v90_v42 = vmul.f32 0.2, %v86_v35  ;;  %v79_v47 = vadd.f32 %v75_v44, %v71_v41 }
  0x24   :  { %v92_v45 = vmul.f32 0.2, %v88_v39 }
  0x25   :  { %v85_v46 = vadd.f32 %v81_v43, %v77_v40  ;;  %94 = vst.msk [vmem:[#allocation6 + $0x8] sm:$0xff] %vm27_vm0, %v90_v42  ;;  %v87_v50 = vadd.f32 %v83_v48, %v79_v47 }
  0x26   :  { %96 = vst.msk [vmem:[#allocation6 + $0x18] sm:$0xff] %vm27_vm0, %v92_v45 }
  0x27   :  { %v89_v49 = vmul.f32 0.2, %v85_v46  ;;  %v91_v51 = vmul.f32 0.2, %v87_v50 }
  0x29   :  { %93 = vst.msk [vmem:[#allocation6] sm:$0xff] %vm27_vm0, %v89_v49  ;;  %95 = vst.msk [vmem:[#allocation6 + $0x10] sm:$0xff] %vm27_vm0, %v91_v51 }
  0x2a   :  { %149 = shalt.err (!%p146_p9)
}
  0x2b   :  { %108 = dma.vmem_to_hbm [thread:$0]  %s103_s13, 512, %s197_s1, [#allocation5], %s163_s9, %s163_s9, %s164_s10  }
  0x2c   :  { %160 = dma.done.wait [#allocation5], 512  }
  0x2d   :  { %161 = vsyncadd [#allocation5], 4294966784 }
  0x2e   :  { %112 = vsyncpa [#allocation4], 1 }
  0x2f   :  { %113 = vsyncpa [#allocation5], 1 }

</bundles_post_ra>
